<compile_context>
chip_gen: v7x
topology: tpu7x:2x2x1
jax: 0.10.0
libtpu: 0.0.40
codegen_flags: <defaults>
</compile_context>

<pallas_src>
import functools

import jax
import jax.numpy as jnp
from jax.experimental import pallas as pl
from jax.experimental.pallas import tpu as pltpu

LANE = 128        # lane width (last dim of the streamed blocks)
TR_MAX = 2048     # rows per block: 2048*128*4B = 1 MiB per f32 input block
                  # (0.5 MiB if inputs arrive as bf16)
NCORES = 2        # parallel split of the reduction (megacore on v7x)


def _loss_kernel(xh_ref, x_ref, mu_ref, lv_ref, out_ref, acc_ref, *,
                 gamma, rows, steps_per_core):
    c = pl.program_id(0)          # core-split index ("parallel")
    k = pl.program_id(1)          # reduction step   ("arbitrary")

    @pl.when(k == 0)
    def _():
        acc_ref[...] = jnp.zeros_like(acc_ref)

    tr = xh_ref.shape[0]          # static block row count (multiple of 8)

    # L1 partial for this block: cast in-kernel (native dtype streamed from
    # HBM), mask rows past the logical end (ragged last block and the
    # duplicated block read by the clamped index_map), then reduce with pure
    # VPU adds into the (8, LANE) vector accumulator.
    diff = jnp.abs(xh_ref[...].astype(jnp.float32)
                   - x_ref[...].astype(jnp.float32))

    gb = c * steps_per_core + k   # UNclamped global block index (for masking)
    row_ids = jax.lax.broadcasted_iota(jnp.int32, (tr, LANE), 0) + gb * tr
    diff = jnp.where(row_ids < rows, diff, 0.0)

    acc_ref[...] += jnp.sum(diff.reshape(tr // 8, 8, LANE), axis=0)

    # Finalize: one cross-lane reduce per core + tiny KLD + gamma blend.
    @pl.when(k == pl.num_programs(1) - 1)
    def _():
        l1_part = jnp.sum(acc_ref[...])
        mu = mu_ref[...].astype(jnp.float32)
        lv = lv_ref[...].astype(jnp.float32)
        kld = -0.5 * jnp.sum(1.0 + lv - mu * mu - jnp.exp(lv))
        # Only the c == 0 partial carries the KLD term (added exactly once).
        partial = gamma * l1_part + jnp.where(c == 0, (1.0 - gamma) * kld, 0.0)
        out_ref[...] = jnp.full(out_ref.shape, partial, dtype=jnp.float32)


def loss_l1_kld(x_hat, x, mu, log_var, gamma: float = 0.9):
    assert x_hat.shape == x.shape
    assert mu.shape == log_var.shape

    n = int(x_hat.size)

    # Flatten (layout-free reshape for contiguous inputs); NO dtype up-cast and
    # NO full-array zero pad. A tiny pad is added only when needed to make the
    # lane dim exact and (for small inputs) the sublane dim a multiple of 8.
    xh = x_hat.reshape(-1)
    xx = x.reshape(-1)

    rem = (-n) % LANE
    rows0 = (n + rem) // LANE
    extra_rows = ((-rows0) % 8) if rows0 < TR_MAX else 0
    pad_elems = rem + extra_rows * LANE
    if pad_elems:
        # zero padding contributes |0-0| = 0 to the L1 sum
        xh = jnp.pad(xh, (0, pad_elems))
        xx = jnp.pad(xx, (0, pad_elems))
    rows = (n + pad_elems) // LANE

    xh = xh.reshape(rows, LANE)
    xx = xx.reshape(rows, LANE)

    mu2 = mu.reshape(mu.shape[0], -1)
    lv2 = log_var.reshape(log_var.shape[0], -1)

    tr = min(TR_MAX, rows)                    # multiple of 8 by construction
    steps = (rows + tr - 1) // tr             # total reduction blocks
    ncores = NCORES if steps >= NCORES else 1
    spc = (steps + ncores - 1) // ncores      # reduction steps per core

    def stream_map(c, k):
        # Clamp so the DMA never targets a fully out-of-bounds block; the
        # kernel masks duplicated / ragged rows using the unclamped index.
        return (jnp.minimum(c * spc + k, steps - 1), 0)

    kernel = functools.partial(_loss_kernel, gamma=float(gamma), rows=rows,
                               steps_per_core=spc)

    out = pl.pallas_call(
        kernel,
        out_shape=jax.ShapeDtypeStruct((ncores, 8, LANE), jnp.float32),
        grid_spec=pltpu.PrefetchScalarGridSpec(
            num_scalar_prefetch=0,
            grid=(ncores, spc),
            in_specs=[
                pl.BlockSpec((tr, LANE), stream_map),
                pl.BlockSpec((tr, LANE), stream_map),
                pl.BlockSpec(mu2.shape, lambda c, k: (0, 0)),   # resident
                pl.BlockSpec(lv2.shape, lambda c, k: (0, 0)),   # resident
            ],
            out_specs=pl.BlockSpec((1, 8, LANE), lambda c, k: (c, 0, 0)),
            scratch_shapes=[pltpu.VMEM((8, LANE), jnp.float32)],
        ),
        compiler_params=pltpu.CompilerParams(
            dimension_semantics=("parallel", "arbitrary"),
            vmem_limit_bytes=32 * 1024 * 1024,
        ),
    )(xh, xx, mu2, lv2)

    # Per-core blended partials -> final scalar (at most one extra add).
    return jnp.sum(out[:, 0, 0])


def _reference(x_hat, x, mu, log_var, gamma=0.9):
    l1 = jnp.sum(jnp.abs(x_hat - x))
    kld = -0.5 * jnp.sum(1.0 + log_var - mu**2 - jnp.exp(log_var))
    return gamma * l1 + (1.0 - gamma) * kld


if __name__ == "__main__":
    key = jax.random.PRNGKey(0)
    k1, k2, k3, k4 = jax.random.split(key, 4)

    # Example shapes: reconstruction (NCHW) and VAE latent stats.
    x_hat = jax.random.normal(k1, (2, 4, 16, 16), dtype=jnp.float32)
    x = jax.random.normal(k2, (2, 4, 16, 16), dtype=jnp.float32)
    mu = jax.random.normal(k3, (2, 32), dtype=jnp.float32)
    log_var = 0.1 * jax.random.normal(k4, (2, 32), dtype=jnp.float32)

    loss_fn = jax.jit(functools.partial(loss_l1_kld, gamma=0.9))
    loss = jax.block_until_ready(loss_fn(x_hat, x, mu, log_var))

    ref = _reference(x_hat, x, mu, log_var, gamma=0.9)
    assert jnp.allclose(loss, ref, rtol=1e-5, atol=1e-4), (loss, ref)

    print("KERNEL_OK")
</pallas_src>

<mosaic_0001>
module attributes {stable_mosaic.version = 11 : i64} {
  func.func @_loss_kernel(%arg0: i32, %arg1: i32, %arg2: memref<16x128xf32, #tpu.memory_space<vmem>>, %arg3: memref<16x128xf32, #tpu.memory_space<vmem>>, %arg4: memref<2x32xf32, #tpu.memory_space<vmem>>, %arg5: memref<2x32xf32, #tpu.memory_space<vmem>>, %arg6: memref<1x8x128xf32, #tpu.memory_space<vmem>>, %arg7: memref<8x128xf32, #tpu.memory_space<vmem>>) attributes {dimension_semantics = [#tpu.dimension_semantics<parallel>, #tpu.dimension_semantics<arbitrary>], iteration_bounds = array<i64: 1, 1>, scalar_prefetch = 0 : i64, scratch_operands = 1 : i64, tpu.core_type = #tpu.core_type<tc>, window_params = [{transform_indices = @transform_0, window_bounds = array<i64: 16, 128>}, {transform_indices = @transform_1, window_bounds = array<i64: 16, 128>}, {pipeline_mode = #tpu.pipeline_mode<synchronous>, transform_indices = @transform_2, window_bounds = array<i64: 2, 32>}, {pipeline_mode = #tpu.pipeline_mode<synchronous>, transform_indices = @transform_3, window_bounds = array<i64: 2, 32>}, {transform_indices = @transform_4, window_bounds = array<i64: 1, 8, 128>}]} {
    %c0_i32 = arith.constant 0 : i32
    %0 = arith.cmpi eq, %arg1, %c0_i32 : i32
    %1 = arith.extui %0 : i1 to i32
    %c0_i32_0 = arith.constant 0 : i32
    %2 = arith.cmpi ne, %1, %c0_i32_0 : i32
    scf.if %2 {
      %cst_12 = arith.constant 0.000000e+00 : f32
      %25 = vector.broadcast %cst_12 : f32 to vector<8x128xf32>
      %c0_13 = arith.constant 0 : index
      %c0_14 = arith.constant 0 : index
      %26 = vector.load %arg7[%c0_13, %c0_14] : memref<8x128xf32, #tpu.memory_space<vmem>>, vector<8x128xf32>
      tpu.vector_store %arg7[%c0_13, %c0_14], %25 {strides = array<i32>} : memref<8x128xf32, #tpu.memory_space<vmem>>, vector<8x128xf32>,
    } else {
    }
    %c0 = arith.constant 0 : index
    %c0_1 = arith.constant 0 : index
    %3 = vector.load %arg2[%c0, %c0_1] : memref<16x128xf32, #tpu.memory_space<vmem>>, vector<16x128xf32>
    %c0_2 = arith.constant 0 : index
    %c0_3 = arith.constant 0 : index
    %4 = vector.load %arg3[%c0_2, %c0_3] : memref<16x128xf32, #tpu.memory_space<vmem>>, vector<16x128xf32>
    %5 = arith.subf %3, %4 : vector<16x128xf32>
    %6 = math.absf %5 : vector<16x128xf32>
    %c1_i32 = arith.constant 1 : i32
    %7 = arith.muli %arg0, %c1_i32 : i32
    %8 = arith.addi %7, %arg1 : i32
    %9 = tpu.iota {dimensions = array<i32: 0>} : vector<16x128xi32>
    %c16_i32 = arith.constant 16 : i32
    %10 = arith.muli %8, %c16_i32 : i32
    %11 = vector.broadcast %10 : i32 to vector<16x128xi32>
    %12 = arith.addi %9, %11 : vector<16x128xi32>
    %c16_i32_4 = arith.constant 16 : i32
    %13 = vector.broadcast %c16_i32_4 : i32 to vector<16x128xi32>
    %14 = arith.cmpi slt, %12, %13 : vector<16x128xi32>
    %cst = arith.constant 0.000000e+00 : f32
    %15 = vector.broadcast %cst : f32 to vector<16x128xf32>
    %16 = arith.select %14, %6, %15 : vector<16x128xi1>, vector<16x128xf32>
    %c0_5 = arith.constant 0 : index
    %c0_6 = arith.constant 0 : index
    %17 = vector.load %arg7[%c0_5, %c0_6] : memref<8x128xf32, #tpu.memory_space<vmem>>, vector<8x128xf32>
    %18 = vector.shape_cast %16 : vector<16x128xf32> to vector<2x8x128xf32>
    %cst_7 = arith.constant dense<0.000000e+00> : vector<8x128xf32>
    %19 = vector.multi_reduction <add>, %18, %cst_7 [0] : vector<2x8x128xf32> to vector<8x128xf32>
    %20 = arith.addf %17, %19 : vector<8x128xf32>
    %c0_8 = arith.constant 0 : index
    %c0_9 = arith.constant 0 : index
    %21 = vector.load %arg7[%c0_8, %c0_9] : memref<8x128xf32, #tpu.memory_space<vmem>>, vector<8x128xf32>
    tpu.vector_store %arg7[%c0_8, %c0_9], %20 {strides = array<i32>} : memref<8x128xf32, #tpu.memory_space<vmem>>, vector<8x128xf32>,
    %c0_i32_10 = arith.constant 0 : i32
    %22 = arith.cmpi eq, %arg1, %c0_i32_10 : i32
    %23 = arith.extui %22 : i1 to i32
    %c0_i32_11 = arith.constant 0 : i32
    %24 = arith.cmpi ne, %23, %c0_i32_11 : i32
    scf.if %24 {
      %c0_12 = arith.constant 0 : index
      %c0_13 = arith.constant 0 : index
      %25 = vector.load %arg7[%c0_12, %c0_13] : memref<8x128xf32, #tpu.memory_space<vmem>>, vector<8x128xf32>
      %26 = vector.shape_cast %25 : vector<8x128xf32> to vector<1x8x128xf32>
      %cst_14 = arith.constant dense<0.000000e+00> : vector<1xf32>
      %27 = vector.multi_reduction <add>, %26, %cst_14 [1, 2] : vector<1x8x128xf32> to vector<1xf32>
      %28 = vector.shape_cast %27 : vector<1xf32> to vector<1x1x1xf32>
      %29 = vector.extract %28[0, 0, 0] : f32 from vector<1x1x1xf32>
      %c0_15 = arith.constant 0 : index
      %c0_16 = arith.constant 0 : index
      %30 = vector.load %arg4[%c0_15, %c0_16] : memref<2x32xf32, #tpu.memory_space<vmem>>, vector<2x32xf32>
      %c0_17 = arith.constant 0 : index
      %c0_18 = arith.constant 0 : index
      %31 = vector.load %arg5[%c0_17, %c0_18] : memref<2x32xf32, #tpu.memory_space<vmem>>, vector<2x32xf32>
      %cst_19 = arith.constant 1.000000e+00 : f32
      %32 = vector.broadcast %cst_19 : f32 to vector<2x32xf32>
      %33 = arith.addf %32, %31 : vector<2x32xf32>
      %34 = arith.mulf %30, %30 : vector<2x32xf32>
      %35 = arith.subf %33, %34 : vector<2x32xf32>
      %36 = math.exp %31 : vector<2x32xf32>
      %37 = arith.subf %35, %36 : vector<2x32xf32>
      %38 = vector.shape_cast %37 : vector<2x32xf32> to vector<1x2x32xf32>
      %cst_20 = arith.constant dense<0.000000e+00> : vector<1xf32>
      %39 = vector.multi_reduction <add>, %38, %cst_20 [1, 2] : vector<1x2x32xf32> to vector<1xf32>
      %40 = vector.shape_cast %39 : vector<1xf32> to vector<1x1x1xf32>
      %41 = vector.extract %40[0, 0, 0] : f32 from vector<1x1x1xf32>
      %cst_21 = arith.constant -5.000000e-01 : f32
      %42 = arith.mulf %cst_21, %41 : f32
      %cst_22 = arith.constant 0.899999976 : f32
      %43 = arith.mulf %cst_22, %29 : f32
      %c0_i32_23 = arith.constant 0 : i32
      %44 = arith.cmpi eq, %arg0, %c0_i32_23 : i32
      %cst_24 = arith.constant 1.000000e-01 : f32
      %45 = arith.mulf %cst_24, %42 : f32
      %cst_25 = arith.constant 0.000000e+00 : f32
      %46 = arith.select %44, %45, %cst_25 : f32
      %47 = arith.addf %43, %46 : f32
      %48 = vector.broadcast %47 : f32 to vector<1x8x128xf32>
      %c0_26 = arith.constant 0 : index
      %c0_27 = arith.constant 0 : index
      %c0_28 = arith.constant 0 : index
      %49 = vector.load %arg6[%c0_26, %c0_27, %c0_28] : memref<1x8x128xf32, #tpu.memory_space<vmem>>, vector<1x8x128xf32>
      tpu.vector_store %arg6[%c0_26, %c0_27, %c0_28], %48 {strides = array<i32>} : memref<1x8x128xf32, #tpu.memory_space<vmem>>, vector<1x8x128xf32>,
    } else {
    }
    return
  }
  func.func @transform_0(%arg0: i32, %arg1: i32) -> (i32, i32) {
    %c1_i32 = arith.constant 1 : i32
    %0 = arith.muli %arg0, %c1_i32 : i32
    %1 = arith.addi %0, %arg1 : i32
    %c0_i32 = arith.constant 0 : i32
    %2 = arith.minsi %1, %c0_i32 : i32
    %c0_i32_0 = arith.constant 0 : i32
    %c0_i32_1 = arith.constant 0 : i32
    return %2, %c0_i32_0 : i32, i32
  }
  func.func @transform_1(%arg0: i32, %arg1: i32) -> (i32, i32) {
    %c1_i32 = arith.constant 1 : i32
    %0 = arith.muli %arg0, %c1_i32 : i32
    %1 = arith.addi %0, %arg1 : i32
    %c0_i32 = arith.constant 0 : i32
    %2 = arith.minsi %1, %c0_i32 : i32
    %c0_i32_0 = arith.constant 0 : i32
    %c0_i32_1 = arith.constant 0 : i32
    return %2, %c0_i32_0 : i32, i32
  }
  func.func @transform_2(%arg0: i32, %arg1: i32) -> (i32, i32) {
    %c0_i32 = arith.constant 0 : i32
    %c0_i32_0 = arith.constant 0 : i32
    %c0_i32_1 = arith.constant 0 : i32
    return %c0_i32, %c0_i32_0 : i32, i32
  }
  func.func @transform_3(%arg0: i32, %arg1: i32) -> (i32, i32) {
    %c0_i32 = arith.constant 0 : i32
    %c0_i32_0 = arith.constant 0 : i32
    %c0_i32_1 = arith.constant 0 : i32
    return %c0_i32, %c0_i32_0 : i32, i32
  }
  func.func @transform_4(%arg0: i32, %arg1: i32) -> (i32, i32, i32) {
    %c0_i32 = arith.constant 0 : i32
    %c0_i32_0 = arith.constant 0 : i32
    %c0_i32_1 = arith.constant 0 : i32
    return %arg0, %c0_i32, %c0_i32_0 : i32, i32, i32
  }
}

</mosaic_0001>

<bundles_post_ra>
// kernel: loss_l1_kld.1
= control target key start
LH: loop header
LB: loop body
LE: loop exit
PB: predicated region body
PF: predicated region fallthrough
CT: control target
= control target key end

     0   :  { %vm131_vm0 = vcmask 254976   ;;  %s218_s0 = inlined_call_operand.vmem [shape: f32[16,128], index: 0, kind: input, shape index: {}]   ;;  %s219_s1 = inlined_call_operand.vmem [shape: f32[16,128], index: 1, kind: input, shape index: {}]   ;;  %s220_s3 = inlined_call_operand.vmem [shape: f32[2,32], index: 3, kind: input, shape index: {}]   ;;  %s221_s2 = inlined_call_operand.vmem [shape: f32[2,32], index: 2, kind: input, shape index: {}]   ;;  %s222_s4 = inlined_call_operand.vmem [shape: f32[1,8,128], index: 4, kind: output, shape index: {}]  }
   0x1   :  { %v86_v0 = vld [vmem:[%s218_s0] sm:$0xff]  ;;  %v87_v1 = vld [vmem:[%s218_s0 + $0x8] sm:$0xff] }
   0x2   :  { %v88_v2 = vld [vmem:[%s219_s1] sm:$0xff]  ;;  %v89_v3 = vld [vmem:[%s219_s1 + $0x8] sm:$0xff] }
   0x3   :  { %v90_v4 = vsub.f32 %v86_v0, %v88_v2  ;;  %v124_v5 = vld [vmem:[%s220_s3] sm:$0x3]  ;;  %v91_v6 = vsub.f32 %v87_v1, %v89_v3 }
   0x4   :  { %v128_v7 = vmul.f32 1.442695, %v124_v5  ;;  %v123_v10 = vld [vmem:[%s221_s2] sm:$0x3]  ;;  %v125_v12 = vadd.f32 1.0, %v124_v5 }
   0x5   :  { %v92_v8 = vand.u32 2147483647, %v90_v4  ;;  %v93_v9 = vand.u32 2147483647, %v91_v6  ;;  %v126_v13 = vmul.f32 %v123_v10, %v123_v10 }
   0x6   :  { %170 = vpow2.f32 %v128_v7 }
   0x7   :  { %v107_v11 = vadd.f32 %v93_v9, %v92_v8  ;;  %v127_v14 = vsub.f32 %v125_v12, %v126_v13 }
   0x9   :  { %114 = vadd.xlane.f32.xlu0 %v107_v11 }
  0x10   :  { %v171_v15 = vpop.eup %170 }
  0x11   :  { %v130_v16 = vsub.f32 %v127_v14, %v171_v15 }
  0x13   :  { %v132_v17 = vsel %vm131_vm0, %v130_v16, 0.0 }
  0x14   :  { %133 = vadd.xlane.f32.xlu0 %v132_v17 }
  0x96   :  { %v115_v18 = vpop.xlane.xlu0 %114 }
  0x97   :  { %v116_v19 = vrot.slane %v115_v18, 4 }
  0x99   :  { %v117_v20 = vadd.f32 %v116_v19, %v115_v18 }
  0x9b   :  { %v118_v21 = vrot.slane %v117_v20, 2 }
  0x9d   :  { %v119_v22 = vadd.f32 %v118_v21, %v117_v20 }
  0x9f   :  { %v120_v23 = vrot.slane %v119_v22, 1 }
  0xa1   :  { %v134_v24 = vpop.xlane.xlu0 %133  ;;  %v121_v26 = vadd.f32 %v120_v23, %v119_v22 }
  0xa2   :  { %v135_v25 = vrot.slane %v134_v24, 4 }
  0xa3   :  { %166 = vpush %v121_v26 }
  0xa4   :  { %v136_v27 = vadd.f32 %v135_v25, %v134_v24 }
  0xa6   :  { %v137_v28 = vrot.slane %v136_v27, 2 }
  0xa8   :  { %v138_v29 = vadd.f32 %v137_v28, %v136_v27 }
  0xaa   :  { %v139_v30 = vrot.slane %v138_v29, 1 }
  0xac   :  { %v140_v31 = vadd.f32 %v139_v30, %v138_v29 }
  0xae   :  { %168 = vpush %v140_v31 }
  0xd4   :  { %s167_s0 = spop %166 }
  0xd5   :  { %s143_s3 = smul.f32 0.9, %s167_s0 }
  0xdf   :  { %s169_s1 = spop %168 }
  0xe0   :  { %s142_s2 = smul.f32 -0.5, %s169_s1 }
  0xe2   :  { %s145_s27 = smul.f32 0.1, %s142_s2 }
  0xe4   :  { %s147_s28 = sadd.f32 %s145_s27, %s143_s3 }
  0xe6   :  { %v148_v32 = vstv %s147_s28 }
  0xe7   :  { %149 = vst [vmem:[%s222_s4] sm:$0xff] %v148_v32 }

</bundles_post_ra>
